<compile_context>
chip_gen: v7x
topology: tpu7x:2x2x1
jax: 0.10.0
libtpu: 0.0.40
codegen_flags: <defaults>
</compile_context>

<pallas_src>
import functools

import jax
import jax.numpy as jnp
from jax.experimental import pallas as pl
from jax.experimental.pallas import tpu as pltpu


def _bce_sum_kernel(p_ref, t_ref, o_ref, *, rows, cols, row_blk, lane_blk,
                    mask_rows, mask_lanes):
    """p_ref/t_ref: (row_blk, lane_blk) VMEM tiles.  o_ref: (1,1) f32 in SMEM.

    Accumulates sum over all valid elements of the numerically-stable
    BCE-with-logits:  bce(x, z) = max(x, 0) - x*z + log(1 + exp(-|x|)).
    """
    i = pl.program_id(0)  # row-block index
    j = pl.program_id(1)  # lane-block index

    x = p_ref[...].astype(jnp.float32)
    z = t_ref[...].astype(jnp.float32)
    bce = jnp.maximum(x, 0.0) - x * z + jnp.log1p(jnp.exp(-jnp.abs(x)))

    # Mask out-of-bounds rows/lanes of remainder blocks (static trace-time
    # branches: no masking work is emitted when the tiling divides evenly).
    if mask_rows:
        r = jax.lax.broadcasted_iota(jnp.int32, bce.shape, 0) + i * row_blk
        bce = jnp.where(r < rows, bce, 0.0)
    if mask_lanes:
        c = jax.lax.broadcasted_iota(jnp.int32, bce.shape, 1) + j * lane_blk
        bce = jnp.where(c < cols, bce, 0.0)

    @pl.when((i == 0) & (j == 0))
    def _():
        o_ref[0, 0] = 0.0

    o_ref[0, 0] = o_ref[0, 0] + jnp.sum(bce)


@functools.partial(
    jax.jit, static_argnames=("ignore_index", "block_rows", "block_lanes"))
def bce_loss_4_brats(predict, target, ignore_index=None,
                     block_rows=None, block_lanes=None):
    """Forward pass of BCELoss4BraTS.

    predict (logits), target: (N, C, H, W), identical shapes.  Returns an f32
    scalar.  ignore_index: optional static channel index to skip.
    block_rows/block_lanes: optional static tile-size overrides (testing).
    """
    assert predict.shape == target.shape, "predict & target shape do not match"
    n, c, h, w = predict.shape

    # Static channel selection (mirrors the Python-level `if i != ignore_index`).
    if ignore_index is not None:
        keep = [i for i in range(c) if i != ignore_index]
        predict = predict[:, keep]
        target = target[:, keep]
        ck = len(keep)
    else:
        ck = c

    # Free contiguous view: (N*Ck) rows, lane-dense (H*W) reduction axis.
    rows = n * ck
    cols = h * w
    p2d = predict.reshape(rows, cols)
    t2d = target.reshape(rows, cols)

    # Tile sizing: cap each input block at ~2 MiB (f32) so
    # 2 inputs x 2 pipeline buffers <= 8 MiB — safe under the scoped-VMEM
    # defaults on v5e (16 MiB) and v6e/v7x (32 MiB), and well within v7x's
    # 64 MiB physical VMEM.  Dims either equal the full extent or are
    # (8,128)-aligned; remainder blocks are masked in-kernel.
    TARGET_ELEMS = 512 * 1024
    if block_rows is None:
        row_blk = rows if rows <= 256 else 256
    else:
        row_blk = block_rows
    if block_lanes is None:
        lane_target = max(128, (TARGET_ELEMS // row_blk) // 128 * 128)
        lane_blk = cols if cols <= lane_target else lane_target
    else:
        lane_blk = block_lanes

    grid = (pl.cdiv(rows, row_blk), pl.cdiv(cols, lane_blk))
    mask_rows = (rows % row_blk) != 0
    mask_lanes = (cols % lane_blk) != 0

    kernel = functools.partial(
        _bce_sum_kernel, rows=rows, cols=cols, row_blk=row_blk,
        lane_blk=lane_blk, mask_rows=mask_rows, mask_lanes=mask_lanes)

    total_elems = rows * cols
    itemsize = jnp.dtype(predict.dtype).itemsize
    cost = pl.CostEstimate(
        flops=6 * total_elems,
        transcendentals=2 * total_elems,
        bytes_accessed=2 * total_elems * itemsize + 4,
    )

    # TODO(synk): on v7x the flattened axis could additionally be split across
    # the 2 TensorCores via a "parallel" axis with per-core partial sums.
    total = pl.pallas_call(
        kernel,
        out_shape=jax.ShapeDtypeStruct((1, 1), jnp.float32),
        grid=grid,
        in_specs=[
            pl.BlockSpec((row_blk, lane_blk), lambda i, j: (i, j)),
            pl.BlockSpec((row_blk, lane_blk), lambda i, j: (i, j)),
        ],
        out_specs=pl.BlockSpec(memory_space=pltpu.MemorySpace.SMEM),
        compiler_params=pltpu.CompilerParams(
            dimension_semantics=("arbitrary", "arbitrary")),
        cost_estimate=cost,
    )(p2d, t2d)

    # Each kept channel's mean divides by N*H*W, so sum-of-means == global
    # sum / (N*H*W).  (`total_loss.mean()` in the reference is a no-op.)
    return total[0, 0] * (1.0 / float(n * h * w))


def _reference(predict, target, ignore_index=None):
    """Plain-JAX reference mirroring the PyTorch module."""
    total = 0.0
    for i in range(target.shape[1]):
        if i != ignore_index:
            x = predict[:, i].astype(jnp.float32)
            z = target[:, i].astype(jnp.float32)
            bce = jnp.maximum(x, 0.0) - x * z + jnp.log1p(jnp.exp(-jnp.abs(x)))
            total = total + jnp.mean(bce)
    return total


if __name__ == "__main__":
    key = jax.random.PRNGKey(0)
    k1, k2, k3, k4 = jax.random.split(key, 4)

    # Test 1: standard small shape, auto tiling (single block).
    N, C, H, W = 2, 4, 16, 16
    predict = jax.random.normal(k1, (N, C, H, W), dtype=jnp.float32)
    target = jax.random.uniform(k2, (N, C, H, W), dtype=jnp.float32)
    loss = bce_loss_4_brats(predict, target)
    jax.block_until_ready(loss)
    ref = _reference(predict, target)
    assert jnp.allclose(loss, ref, rtol=1e-5, atol=1e-5), (loss, ref)

    # Test 2: awkward shape + forced small blocks -> multi-step grid with
    # row AND lane remainder masking plus cross-block accumulation.
    N2, C2, H2, W2 = 3, 4, 16, 10
    p2 = jax.random.normal(k3, (N2, C2, H2, W2), dtype=jnp.float32)
    t2 = jax.random.uniform(k4, (N2, C2, H2, W2), dtype=jnp.float32)
    loss2 = bce_loss_4_brats(p2, t2, block_rows=8, block_lanes=128)
    jax.block_until_ready(loss2)
    ref2 = _reference(p2, t2)
    assert jnp.allclose(loss2, ref2, rtol=1e-5, atol=1e-5), (loss2, ref2)

    # Test 3: ignore_index path.
    loss3 = bce_loss_4_brats(predict, target, ignore_index=1)
    jax.block_until_ready(loss3)
    ref3 = _reference(predict, target, ignore_index=1)
    assert jnp.allclose(loss3, ref3, rtol=1e-5, atol=1e-5), (loss3, ref3)

    print("KERNEL_OK")
</pallas_src>

<mosaic_0001>
module attributes {stable_mosaic.version = 11 : i64} {
  func.func @_bce_sum_kernel(%arg0: i32, %arg1: i32, %arg2: memref<8x256xf32, #tpu.memory_space<vmem>>, %arg3: memref<8x256xf32, #tpu.memory_space<vmem>>, %arg4: memref<1x1xf32, #tpu.memory_space<smem>>) attributes {dimension_semantics = [#tpu.dimension_semantics<arbitrary>, #tpu.dimension_semantics<arbitrary>], iteration_bounds = array<i64: 1, 1>, scalar_prefetch = 0 : i64, scratch_operands = 0 : i64, tpu.core_type = #tpu.core_type<tc>, window_params = [{transform_indices = @transform_0, window_bounds = array<i64: 8, 256>}, {transform_indices = @transform_1, window_bounds = array<i64: 8, 256>}, {transform_indices = @transform_2, window_bounds = array<i64: 1, 1>}]} {
    %c0 = arith.constant 0 : index
    %c0_0 = arith.constant 0 : index
    %0 = vector.load %arg2[%c0, %c0_0] : memref<8x256xf32, #tpu.memory_space<vmem>>, vector<8x256xf32>
    %c0_1 = arith.constant 0 : index
    %c0_2 = arith.constant 0 : index
    %1 = vector.load %arg3[%c0_1, %c0_2] : memref<8x256xf32, #tpu.memory_space<vmem>>, vector<8x256xf32>
    %cst = arith.constant 0.000000e+00 : f32
    %2 = vector.broadcast %cst : f32 to vector<8x256xf32>
    %3 = arith.maximumf %0, %2 : vector<8x256xf32>
    %4 = arith.mulf %0, %1 : vector<8x256xf32>
    %5 = arith.subf %3, %4 : vector<8x256xf32>
    %6 = math.absf %0 : vector<8x256xf32>
    %cst_3 = arith.constant 0.000000e+00 : f32
    %7 = vector.broadcast %cst_3 : f32 to vector<8x256xf32>
    %8 = arith.subf %7, %6 : vector<8x256xf32>
    %9 = math.exp %8 : vector<8x256xf32>
    %10 = math.log1p %9 : vector<8x256xf32>
    %11 = arith.addf %5, %10 : vector<8x256xf32>
    %c0_i32 = arith.constant 0 : i32
    %12 = arith.cmpi eq, %arg0, %c0_i32 : i32
    %c0_i32_4 = arith.constant 0 : i32
    %13 = arith.cmpi eq, %arg1, %c0_i32_4 : i32
    %14 = arith.andi %12, %13 : i1
    %15 = arith.extui %14 : i1 to i32
    %c0_i32_5 = arith.constant 0 : i32
    %16 = arith.cmpi ne, %15, %c0_i32_5 : i32
    scf.if %16 {
      %cst_11 = arith.constant 0.000000e+00 : f32
      %c0_12 = arith.constant 0 : index
      %c0_13 = arith.constant 0 : index
      %24 = memref.load %arg4[%c0_12, %c0_13] : memref<1x1xf32, #tpu.memory_space<smem>>
      memref.store %cst_11, %arg4[%c0_12, %c0_13] : memref<1x1xf32, #tpu.memory_space<smem>>
    } else {
    }
    %c0_6 = arith.constant 0 : index
    %c0_7 = arith.constant 0 : index
    %17 = memref.load %arg4[%c0_6, %c0_7] : memref<1x1xf32, #tpu.memory_space<smem>>
    %18 = vector.shape_cast %11 : vector<8x256xf32> to vector<1x8x256xf32>
    %cst_8 = arith.constant dense<0.000000e+00> : vector<1xf32>
    %19 = vector.multi_reduction <add>, %18, %cst_8 [1, 2] : vector<1x8x256xf32> to vector<1xf32>
    %20 = vector.shape_cast %19 : vector<1xf32> to vector<1x1x1xf32>
    %21 = vector.extract %20[0, 0, 0] : f32 from vector<1x1x1xf32>
    %22 = arith.addf %17, %21 : f32
    %c0_9 = arith.constant 0 : index
    %c0_10 = arith.constant 0 : index
    %23 = memref.load %arg4[%c0_9, %c0_10] : memref<1x1xf32, #tpu.memory_space<smem>>
    memref.store %22, %arg4[%c0_9, %c0_10] : memref<1x1xf32, #tpu.memory_space<smem>>
    return
  }
  func.func @transform_0(%arg0: i32, %arg1: i32) -> (i32, i32) {
    %c0_i32 = arith.constant 0 : i32
    return %arg0, %arg1 : i32, i32
  }
  func.func @transform_1(%arg0: i32, %arg1: i32) -> (i32, i32) {
    %c0_i32 = arith.constant 0 : i32
    return %arg0, %arg1 : i32, i32
  }
  func.func @transform_2(%arg0: i32, %arg1: i32) -> (i32, i32) {
    %c0_i32 = arith.constant 0 : i32
    %c0_i32_0 = arith.constant 0 : i32
    %c0_i32_1 = arith.constant 0 : i32
    return %c0_i32, %c0_i32_0 : i32, i32
  }
}

</mosaic_0001>

<bundles_post_ra>
// kernel: bce_loss_4_brats.1
= control target key start
LH: loop header
LB: loop body
LE: loop exit
PB: predicated region body
PF: predicated region fallthrough
CT: control target
= control target key end

     0   :  { %s149_s0 = inlined_call_operand.vmem [shape: f32[8,256], index: 0, kind: input, shape index: {}]   ;;  %s150_s1 = inlined_call_operand.vmem [shape: f32[8,256], index: 1, kind: input, shape index: {}]   ;;  %s151_s2 = inlined_call_operand.hbm [shape: f32[1,1], index: 2, kind: output, shape index: {}]  }
   0x1   :  { %v12_v0 = vld [vmem:[%s149_s0] sm:$0xff]  ;;  %v13_v1 = vld [vmem:[%s149_s0 + $0x8] sm:$0xff] }
   0x2   :  { %v22_v2 = vand.u32 2147483647, %v12_v0  ;;  %v23_v3 = vand.u32 2147483647, %v13_v1 }
   0x3   :  { %7 = vsyncpa [#allocation3], 0  ;;  %v14_v14 = vld [vmem:[%s150_s1] sm:$0xff]  ;;  %v15_v15 = vld [vmem:[%s150_s1 + $0x8] sm:$0xff]  ;;  %v16_v17 = vmax.f32 %v12_v0, 0.0  ;;  %v17_v21 = vmax.f32 %v13_v1, 0.0 }
   0x4   :  { %v24_v4 = vsub.f32 0.0, %v22_v2  ;;  %v25_v5 = vsub.f32 0.0, %v23_v3  ;;  %v18_v18 = vmul.f32 %v14_v14, %v12_v0  ;;  %v19_v22 = vmul.f32 %v15_v15, %v13_v1  ;;  %s97_s18 = scalar_lea.hbm %s151_s2, 16 }
   0x5   :  { %p98_p0 = scmp.ne.s32.totalorder %s151_s2, %s97_s18  ;;  %p101_p1 = scmp.lt.u32.totalorder %s97_s18, %s151_s2 }
   0x6   :  { %v26_v6 = vmul.f32 1.442695, %v24_v4  ;;  %v28_v7 = vmul.f32 1.442695, %v25_v5  ;;  %v20_v26 = vsub.f32 %v16_v17, %v18_v18  ;;  %v21_v29 = vsub.f32 %v17_v21, %v19_v22 }
   0x7   :  { %p103_p2 = pnand %p101_p1, %p98_p0 }
   0x8   :  { %89 = vpow2.f32 %v26_v6 }
   0x9   :  { %91 = vpow2.f32 %v28_v7 }
  0x12   :  { %v90_v8 = vpop.eup %89 }
  0x13   :  { %v92_v9 = vpop.eup %91  ;;  %v30_v10 = vadd.f32 1.0, %v90_v8  ;;  %v33_v12 = vmul.f32 -0.5, %v90_v8  ;;  %v36_v19 = vand.u32 2147483647, %v90_v8 }
  0x14   :  { %v39_v11 = vadd.f32 1.0, %v92_v9  ;;  %v42_v13 = vmul.f32 -0.5, %v92_v9  ;;  %v45_v23 = vand.u32 2147483647, %v92_v9 }
  0x15   :  { %93 = vlog2.f32 %v30_v10  ;;  %v34_v16 = vadd.f32 1.0, %v33_v12  ;;  %vm37_vm0 = vcmp.lt.f32.partialorder %v36_v19, 0.0004427343 }
  0x16   :  { %95 = vlog2.f32 %v39_v11  ;;  %v43_v20 = vadd.f32 1.0, %v42_v13  ;;  %vm46_vm1 = vcmp.lt.f32.partialorder %v45_v23, 0.0004427343 }
  0x17   :  { %v35_v24 = vmul.f32 %v90_v8, %v34_v16 }
  0x18   :  { %v44_v27 = vmul.f32 %v92_v9, %v43_v20 }
  0x1f   :  { %v94_v25 = vpop.eup %93 }
  0x20   :  { %v96_v28 = vpop.eup %95  ;;  %v32_v30 = vmul.f32 0.6931472, %v94_v25 }
  0x21   :  { %v41_v31 = vmul.f32 0.6931472, %v96_v28 }
  0x22   :  { %v38_v32 = vsel %vm37_vm0, %v35_v24, %v32_v30 }
  0x23   :  { %v47_v33 = vsel %vm46_vm1, %v44_v27, %v41_v31  ;;  %v48_v34 = vadd.f32 %v38_v32, %v20_v26 }
  0x24   :  { %v49_v35 = vadd.f32 %v47_v33, %v21_v29 }
  0x26   :  { %v59_v36 = vadd.f32 %v49_v35, %v48_v34 }
  0x28   :  { %60 = vadd.xlane.f32.xlu0 %v59_v36 }
  0xb5   :  { %v61_v37 = vpop.xlane.xlu0 %60 }
  0xb6   :  { %v62_v38 = vrot.slane %v61_v37, 4 }
  0xb8   :  { %v63_v39 = vadd.f32 %v62_v38, %v61_v37 }
  0xba   :  { %v64_v40 = vrot.slane %v63_v39, 2 }
  0xbc   :  { %v65_v41 = vadd.f32 %v64_v40, %v63_v39 }
  0xbe   :  { %v66_v42 = vrot.slane %v65_v41, 1 }
  0xc0   :  { %v67_v43 = vadd.f32 %v66_v42, %v65_v41 }
  0xc2   :  { %85 = vpush %v67_v43 }
  0xf3   :  { %s86_s1 = spop %85 }
  0xf4   :  { %71 = sst [smem:[#allocation2]] %s86_s1 }
  0xf5   :  { %106 = shalt.err (!%p103_p2)
}
  0xf6   :  { %s109_s23 = smov [#allocation2]  }
  0xf7   :  { %79 = dma.smem_to_hbm %s109_s23, 16, %s151_s2, [#allocation3]  }
  0xf8   :  { %107 = dma.done.wait [#allocation3], 16  }
  0xf9   :  { %108 = vsyncadd [#allocation3], 4294967280 }
  0xfa   :  { %83 = sfence }
  0xfb   :  { %84 = vsyncpa [#allocation3], 1 }

</bundles_post_ra>
